<compile_context>
chip_gen: v6e
topology: v6e:2x2x1
jax: 0.10.0
libtpu: 0.0.40
codegen_flags: <defaults>
</compile_context>

<pallas_src>
import jax
import jax.numpy as jnp
from jax.experimental import pallas as pl
from jax.experimental.pallas import tpu as pltpu

# ----------------------------- configuration -------------------------------
SEQ = 16                      # num_tokens
HIDDEN = 64                   # hidden_size
NUM_HEADS = 4                 # num_attention_heads
NUM_KV_HEADS = 2              # num_key_value_heads
HEAD_DIM = HIDDEN // NUM_HEADS
GROUP = NUM_HEADS // NUM_KV_HEADS
SHARED_I = 128                # shared_intermediate_size
RMS_EPS = 1e-6
ROPE_BASE = 10000.0
ATTENTION_MULTIPLIER = 0.25   # config.attention_multiplier (attn scale)
RESIDUAL_MULTIPLIER = 0.22    # config.residual_multiplier
QKV_OUT = (NUM_HEADS + 2 * NUM_KV_HEADS) * HEAD_DIM   # 128


# ----------------------------- fused kernel ---------------------------------
def _layer_kernel(x_ref, ln1_ref, ln2_ref, wqkv_ref, wo_ref, win_ref, wout_ref,
                  cos_ref, sin_ref, out_ref):
    f32 = jnp.float32
    bf16 = jnp.bfloat16

    x = x_ref[...].astype(f32)                               # (T, H)
    residual = x

    # ---- input RMSNorm (f32) ----
    var = jnp.mean(x * x, axis=-1, keepdims=True)
    h = x * jax.lax.rsqrt(var + RMS_EPS) * ln1_ref[...]      # (T, H)

    # ---- qkv projection (bf16 MXU operands, f32 accumulate) ----
    qkv = jnp.dot(h.astype(bf16), wqkv_ref[...],
                  preferred_element_type=f32)                # (T, QKV_OUT)

    # ---- neox RoPE on per-head lane slices of the qkv slab ----
    cos = cos_ref[...]                                       # (T, D) f32
    sin = sin_ref[...]
    hd = HEAD_DIM
    half = hd // 2

    def rope(xh):                                            # xh: (T, D)
        x1 = xh[:, :half]
        x2 = xh[:, half:]
        rot = jnp.concatenate([-x2, x1], axis=-1)            # rotate_half (neox)
        return xh * cos + rot * sin

    q_heads = [rope(qkv[:, i * hd:(i + 1) * hd]) for i in range(NUM_HEADS)]
    k_off = NUM_HEADS * hd
    k_heads = [rope(qkv[:, k_off + i * hd:k_off + (i + 1) * hd])
               for i in range(NUM_KV_HEADS)]
    v_off = (NUM_HEADS + NUM_KV_HEADS) * hd
    v_heads = [qkv[:, v_off + i * hd:v_off + (i + 1) * hd]
               for i in range(NUM_KV_HEADS)]

    # ---- causal mask, built once (hoisted out of the head loop) ----
    t = x.shape[0]
    row = jax.lax.broadcasted_iota(jnp.int32, (t, t), 0)
    col = jax.lax.broadcasted_iota(jnp.int32, (t, t), 1)
    causal = col <= row                                      # (T, T) bool
    causal_g = jnp.concatenate([causal] * GROUP, axis=0)     # (GROUP*T, T)

    # ---- GQA attention: loop over KV heads, stack GROUP query heads ----
    attn_heads = []
    for kv in range(NUM_KV_HEADS):
        q_stack = jnp.concatenate(
            [q_heads[kv * GROUP + g] for g in range(GROUP)], axis=0)  # (G*T, D)
        k = k_heads[kv]
        v = v_heads[kv]
        s = jnp.dot(q_stack.astype(bf16), k.astype(bf16).T,
                    preferred_element_type=f32) * ATTENTION_MULTIPLIER
        s = jnp.where(causal_g, s, -jnp.inf)
        m = jnp.max(s, axis=-1, keepdims=True)
        p = jnp.exp(s - m)
        denom = jnp.sum(p, axis=-1, keepdims=True)
        p = p * pl.reciprocal(denom, approx=True)
        o = jnp.dot(p.astype(bf16), v.astype(bf16),
                    preferred_element_type=f32)              # (G*T, D)
        for g in range(GROUP):
            attn_heads.append(o[g * t:(g + 1) * t, :])
    attn = jnp.concatenate(attn_heads, axis=-1)              # (T, H), lane-dense

    # ---- o_proj + residual ----
    attn_out = jnp.dot(attn.astype(bf16), wo_ref[...],
                       preferred_element_type=f32)           # (T, H)
    hidden = residual + attn_out * RESIDUAL_MULTIPLIER
    residual2 = hidden

    # ---- post-attention RMSNorm (f32) ----
    var2 = jnp.mean(hidden * hidden, axis=-1, keepdims=True)
    h2 = hidden * jax.lax.rsqrt(var2 + RMS_EPS) * ln2_ref[...]

    # ---- shared_mlp: SwiGLU (SiluAndMul) ----
    gu = jnp.dot(h2.astype(bf16), win_ref[...],
                 preferred_element_type=f32)                 # (T, 2*SHARED_I)
    g = gu[:, :SHARED_I]
    u = gu[:, SHARED_I:]
    act = g * jax.nn.sigmoid(g) * u                          # f32 elementwise
    mlp = jnp.dot(act.astype(bf16), wout_ref[...],
                  preferred_element_type=f32)                # (T, H)

    hidden_final = residual2 + mlp * RESIDUAL_MULTIPLIER

    # pack (hidden, residual) into one lane-dense (T, 2H)=(16,128) slab
    out_ref[...] = jnp.concatenate([hidden_final, residual2], axis=-1)


# ------------------------------- wrappers ------------------------------------
def rope_cos_sin(positions):
    inv_freq = 1.0 / (ROPE_BASE ** (jnp.arange(0, HEAD_DIM, 2, dtype=jnp.float32)
                                    / HEAD_DIM))
    freqs = positions.astype(jnp.float32)[:, None] * inv_freq[None, :]
    return jnp.cos(freqs), jnp.sin(freqs)                    # (T, D//2) each


def decoder_layer(positions, hidden_states, params):
    """GraniteMoeHybridAttentionDecoderLayer.forward -> (hidden_states, residual)."""
    cos, sin = rope_cos_sin(positions)
    cos_full = jnp.concatenate([cos, cos], axis=-1)          # (T, D)
    sin_full = jnp.concatenate([sin, sin], axis=-1)          # (T, D)

    out = pl.pallas_call(
        _layer_kernel,
        out_shape=jax.ShapeDtypeStruct((SEQ, 2 * HIDDEN), jnp.float32),
    )(
        hidden_states,
        params["ln1_w"].reshape(1, HIDDEN),
        params["ln2_w"].reshape(1, HIDDEN),
        params["wqkv"].astype(jnp.bfloat16),
        params["wo"].astype(jnp.bfloat16),
        params["w_in"].astype(jnp.bfloat16),
        params["w_out"].astype(jnp.bfloat16),
        cos_full,
        sin_full,
    )
    hidden = out[:, :HIDDEN]
    residual = out[:, HIDDEN:]
    return hidden, residual


# ---------------------------- pure-JAX reference -----------------------------
def apply_rope_neox(x, cos, sin):
    # x: (T, nheads, D); cos/sin: (T, D//2)
    half = x.shape[-1] // 2
    x1, x2 = x[..., :half], x[..., half:]
    c, s = cos[:, None, :], sin[:, None, :]
    return jnp.concatenate([x1 * c - x2 * s, x2 * c + x1 * s], axis=-1)


def reference(positions, hidden_states, params):
    def rms(x, w):
        var = jnp.mean(x * x, axis=-1, keepdims=True)
        return x * jax.lax.rsqrt(var + RMS_EPS) * w[None, :]

    residual = hidden_states
    h = rms(hidden_states, params["ln1_w"])
    qkv = h @ params["wqkv"]
    q = qkv[:, :NUM_HEADS * HEAD_DIM].reshape(SEQ, NUM_HEADS, HEAD_DIM)
    k = qkv[:, NUM_HEADS * HEAD_DIM:(NUM_HEADS + NUM_KV_HEADS) * HEAD_DIM]
    k = k.reshape(SEQ, NUM_KV_HEADS, HEAD_DIM)
    v = qkv[:, (NUM_HEADS + NUM_KV_HEADS) * HEAD_DIM:]
    v = v.reshape(SEQ, NUM_KV_HEADS, HEAD_DIM)
    cos, sin = rope_cos_sin(positions)
    q = apply_rope_neox(q, cos, sin)
    k = apply_rope_neox(k, cos, sin)
    k = jnp.repeat(k, GROUP, axis=1)
    v = jnp.repeat(v, GROUP, axis=1)
    s = jnp.einsum("thd,shd->hts", q, k) * ATTENTION_MULTIPLIER
    mask = jnp.tril(jnp.ones((SEQ, SEQ), dtype=bool))
    s = jnp.where(mask[None], s, -jnp.inf)
    p = jax.nn.softmax(s, axis=-1)
    o = jnp.einsum("hts,shd->thd", p, v).reshape(SEQ, HIDDEN)
    attn = o @ params["wo"]
    hidden = residual + attn * RESIDUAL_MULTIPLIER
    residual = hidden
    h = rms(hidden, params["ln2_w"])
    gu = h @ params["w_in"]
    g, u = gu[:, :SHARED_I], gu[:, SHARED_I:]
    mlp = (g * jax.nn.sigmoid(g) * u) @ params["w_out"]
    hidden = residual + mlp * RESIDUAL_MULTIPLIER
    return hidden, residual


# ---------------------------------- main -------------------------------------
if __name__ == "__main__":
    key = jax.random.PRNGKey(0)
    ks = jax.random.split(key, 8)

    hidden_states = jax.random.normal(ks[0], (SEQ, HIDDEN), jnp.float32)
    positions = jnp.arange(SEQ, dtype=jnp.int32)

    params = {
        "ln1_w": 1.0 + 0.1 * jax.random.normal(ks[1], (HIDDEN,), jnp.float32),
        "ln2_w": 1.0 + 0.1 * jax.random.normal(ks[2], (HIDDEN,), jnp.float32),
        "wqkv": 0.05 * jax.random.normal(ks[3], (HIDDEN, QKV_OUT), jnp.float32),
        "wo": 0.05 * jax.random.normal(ks[4], (HIDDEN, HIDDEN), jnp.float32),
        "w_in": 0.05 * jax.random.normal(ks[5], (HIDDEN, 2 * SHARED_I), jnp.float32),
        "w_out": 0.05 * jax.random.normal(ks[6], (SHARED_I, HIDDEN), jnp.float32),
    }

    out_hidden, out_residual = decoder_layer(positions, hidden_states, params)
    jax.block_until_ready((out_hidden, out_residual))

    ref_hidden, ref_residual = reference(positions, hidden_states, params)
    assert out_hidden.shape == (SEQ, HIDDEN) and out_residual.shape == (SEQ, HIDDEN)
    assert jnp.allclose(out_hidden, ref_hidden, rtol=2e-2, atol=2e-2)
    assert jnp.allclose(out_residual, ref_residual, rtol=2e-2, atol=2e-2)

    print("KERNEL_OK")
</pallas_src>

<mosaic_0001>
module attributes {stable_mosaic.version = 11 : i64} {
  func.func @_layer_kernel(%arg0: memref<16x64xf32, #tpu.memory_space<vmem>>, %arg1: memref<1x64xf32, #tpu.memory_space<vmem>>, %arg2: memref<1x64xf32, #tpu.memory_space<vmem>>, %arg3: memref<64x128xbf16, #tpu.memory_space<vmem>>, %arg4: memref<64x64xbf16, #tpu.memory_space<vmem>>, %arg5: memref<64x256xbf16, #tpu.memory_space<vmem>>, %arg6: memref<128x64xbf16, #tpu.memory_space<vmem>>, %arg7: memref<16x16xf32, #tpu.memory_space<vmem>>, %arg8: memref<16x16xf32, #tpu.memory_space<vmem>>, %arg9: memref<16x128xf32, #tpu.memory_space<vmem>>) attributes {dimension_semantics = [], scalar_prefetch = 0 : i64, scratch_operands = 0 : i64, tpu.core_type = #tpu.core_type<tc>} {
    %c0 = arith.constant 0 : index
    %c0_0 = arith.constant 0 : index
    %0 = vector.load %arg0[%c0, %c0_0] : memref<16x64xf32, #tpu.memory_space<vmem>>, vector<16x64xf32>
    %1 = arith.mulf %0, %0 : vector<16x64xf32>
    %cst = arith.constant dense<0.000000e+00> : vector<16xf32>
    %2 = vector.multi_reduction <add>, %1, %cst [1] : vector<16x64xf32> to vector<16xf32>
    %3 = vector.shape_cast %2 : vector<16xf32> to vector<16x1xf32>
    %cst_1 = arith.constant 6.400000e+01 : f32
    %4 = vector.broadcast %cst_1 : f32 to vector<16x1xf32>
    %5 = arith.divf %3, %4 : vector<16x1xf32>
    %cst_2 = arith.constant 9.99999997E-7 : f32
    %6 = vector.broadcast %cst_2 : f32 to vector<16x1xf32>
    %7 = arith.addf %5, %6 : vector<16x1xf32>
    %8 = math.rsqrt %7 : vector<16x1xf32>
    %9 = vector.broadcast %8 : vector<16x1xf32> to vector<16x64xf32>
    %10 = arith.mulf %0, %9 : vector<16x64xf32>
    %c0_3 = arith.constant 0 : index
    %c0_4 = arith.constant 0 : index
    %11 = vector.load %arg1[%c0_3, %c0_4] : memref<1x64xf32, #tpu.memory_space<vmem>>, vector<1x64xf32>
    %12 = vector.broadcast %11 : vector<1x64xf32> to vector<16x64xf32>
    %13 = arith.mulf %10, %12 : vector<16x64xf32>
    %14 = arith.truncf %13 : vector<16x64xf32> to vector<16x64xbf16>
    %c0_5 = arith.constant 0 : index
    %c0_6 = arith.constant 0 : index
    %15 = vector.load %arg3[%c0_5, %c0_6] : memref<64x128xbf16, #tpu.memory_space<vmem>>, vector<64x128xbf16>
    %cst_7 = arith.constant dense<0.000000e+00> : vector<16x128xf32>
    %16 = tpu.matmul %14, %15, %cst_7 {dimension_numbers = #tpu.dot_dimension_numbers<[1], [0], [0], [1], [0, 0, 1, 1], [], []>} : vector<16x64xbf16>, vector<64x128xbf16>, vector<16x128xf32> -> vector<16x128xf32>
    %c0_8 = arith.constant 0 : index
    %c0_9 = arith.constant 0 : index
    %17 = vector.load %arg7[%c0_8, %c0_9] : memref<16x16xf32, #tpu.memory_space<vmem>>, vector<16x16xf32>
    %c0_10 = arith.constant 0 : index
    %c0_11 = arith.constant 0 : index
    %18 = vector.load %arg8[%c0_10, %c0_11] : memref<16x16xf32, #tpu.memory_space<vmem>>, vector<16x16xf32>
    %19 = vector.extract_strided_slice %16 {offsets = [0, 0], sizes = [16, 16], strides = [1, 1]} : vector<16x128xf32> to vector<16x16xf32>
    %20 = vector.extract_strided_slice %19 {offsets = [0, 0], sizes = [16, 8], strides = [1, 1]} : vector<16x16xf32> to vector<16x8xf32>
    %21 = vector.extract_strided_slice %19 {offsets = [0, 8], sizes = [16, 8], strides = [1, 1]} : vector<16x16xf32> to vector<16x8xf32>
    %cst_12 = arith.constant 0.000000e+00 : f32
    %22 = vector.broadcast %cst_12 : f32 to vector<16x8xf32>
    %23 = arith.subf %22, %21 : vector<16x8xf32>
    %24 = tpu.concatenate %23, %20 in 1 : vector<16x8xf32>, vector<16x8xf32> -> vector<16x16xf32>
    %25 = arith.mulf %19, %17 : vector<16x16xf32>
    %26 = arith.mulf %24, %18 : vector<16x16xf32>
    %27 = arith.addf %25, %26 : vector<16x16xf32>
    %28 = vector.extract_strided_slice %16 {offsets = [0, 16], sizes = [16, 16], strides = [1, 1]} : vector<16x128xf32> to vector<16x16xf32>
    %29 = vector.extract_strided_slice %28 {offsets = [0, 0], sizes = [16, 8], strides = [1, 1]} : vector<16x16xf32> to vector<16x8xf32>
    %30 = vector.extract_strided_slice %28 {offsets = [0, 8], sizes = [16, 8], strides = [1, 1]} : vector<16x16xf32> to vector<16x8xf32>
    %cst_13 = arith.constant 0.000000e+00 : f32
    %31 = vector.broadcast %cst_13 : f32 to vector<16x8xf32>
    %32 = arith.subf %31, %30 : vector<16x8xf32>
    %33 = tpu.concatenate %32, %29 in 1 : vector<16x8xf32>, vector<16x8xf32> -> vector<16x16xf32>
    %34 = arith.mulf %28, %17 : vector<16x16xf32>
    %35 = arith.mulf %33, %18 : vector<16x16xf32>
    %36 = arith.addf %34, %35 : vector<16x16xf32>
    %37 = vector.extract_strided_slice %16 {offsets = [0, 32], sizes = [16, 16], strides = [1, 1]} : vector<16x128xf32> to vector<16x16xf32>
    %38 = vector.extract_strided_slice %37 {offsets = [0, 0], sizes = [16, 8], strides = [1, 1]} : vector<16x16xf32> to vector<16x8xf32>
    %39 = vector.extract_strided_slice %37 {offsets = [0, 8], sizes = [16, 8], strides = [1, 1]} : vector<16x16xf32> to vector<16x8xf32>
    %cst_14 = arith.constant 0.000000e+00 : f32
    %40 = vector.broadcast %cst_14 : f32 to vector<16x8xf32>
    %41 = arith.subf %40, %39 : vector<16x8xf32>
    %42 = tpu.concatenate %41, %38 in 1 : vector<16x8xf32>, vector<16x8xf32> -> vector<16x16xf32>
    %43 = arith.mulf %37, %17 : vector<16x16xf32>
    %44 = arith.mulf %42, %18 : vector<16x16xf32>
    %45 = arith.addf %43, %44 : vector<16x16xf32>
    %46 = vector.extract_strided_slice %16 {offsets = [0, 48], sizes = [16, 16], strides = [1, 1]} : vector<16x128xf32> to vector<16x16xf32>
    %47 = vector.extract_strided_slice %46 {offsets = [0, 0], sizes = [16, 8], strides = [1, 1]} : vector<16x16xf32> to vector<16x8xf32>
    %48 = vector.extract_strided_slice %46 {offsets = [0, 8], sizes = [16, 8], strides = [1, 1]} : vector<16x16xf32> to vector<16x8xf32>
    %cst_15 = arith.constant 0.000000e+00 : f32
    %49 = vector.broadcast %cst_15 : f32 to vector<16x8xf32>
    %50 = arith.subf %49, %48 : vector<16x8xf32>
    %51 = tpu.concatenate %50, %47 in 1 : vector<16x8xf32>, vector<16x8xf32> -> vector<16x16xf32>
    %52 = arith.mulf %46, %17 : vector<16x16xf32>
    %53 = arith.mulf %51, %18 : vector<16x16xf32>
    %54 = arith.addf %52, %53 : vector<16x16xf32>
    %55 = vector.extract_strided_slice %16 {offsets = [0, 64], sizes = [16, 16], strides = [1, 1]} : vector<16x128xf32> to vector<16x16xf32>
    %56 = vector.extract_strided_slice %55 {offsets = [0, 0], sizes = [16, 8], strides = [1, 1]} : vector<16x16xf32> to vector<16x8xf32>
    %57 = vector.extract_strided_slice %55 {offsets = [0, 8], sizes = [16, 8], strides = [1, 1]} : vector<16x16xf32> to vector<16x8xf32>
    %cst_16 = arith.constant 0.000000e+00 : f32
    %58 = vector.broadcast %cst_16 : f32 to vector<16x8xf32>
    %59 = arith.subf %58, %57 : vector<16x8xf32>
    %60 = tpu.concatenate %59, %56 in 1 : vector<16x8xf32>, vector<16x8xf32> -> vector<16x16xf32>
    %61 = arith.mulf %55, %17 : vector<16x16xf32>
    %62 = arith.mulf %60, %18 : vector<16x16xf32>
    %63 = arith.addf %61, %62 : vector<16x16xf32>
    %64 = vector.extract_strided_slice %16 {offsets = [0, 80], sizes = [16, 16], strides = [1, 1]} : vector<16x128xf32> to vector<16x16xf32>
    %65 = vector.extract_strided_slice %64 {offsets = [0, 0], sizes = [16, 8], strides = [1, 1]} : vector<16x16xf32> to vector<16x8xf32>
    %66 = vector.extract_strided_slice %64 {offsets = [0, 8], sizes = [16, 8], strides = [1, 1]} : vector<16x16xf32> to vector<16x8xf32>
    %cst_17 = arith.constant 0.000000e+00 : f32
    %67 = vector.broadcast %cst_17 : f32 to vector<16x8xf32>
    %68 = arith.subf %67, %66 : vector<16x8xf32>
    %69 = tpu.concatenate %68, %65 in 1 : vector<16x8xf32>, vector<16x8xf32> -> vector<16x16xf32>
    %70 = arith.mulf %64, %17 : vector<16x16xf32>
    %71 = arith.mulf %69, %18 : vector<16x16xf32>
    %72 = arith.addf %70, %71 : vector<16x16xf32>
    %73 = vector.extract_strided_slice %16 {offsets = [0, 96], sizes = [16, 16], strides = [1, 1]} : vector<16x128xf32> to vector<16x16xf32>
    %74 = vector.extract_strided_slice %16 {offsets = [0, 112], sizes = [16, 16], strides = [1, 1]} : vector<16x128xf32> to vector<16x16xf32>
    %75 = tpu.iota {dimensions = array<i32: 0>} : vector<16x16xi32>
    %76 = tpu.iota {dimensions = array<i32: 1>} : vector<16x16xi32>
    %77 = arith.cmpi sle, %76, %75 : vector<16x16xi32>
    %78 = tpu.concatenate %77, %77 in 0 : vector<16x16xi1>, vector<16x16xi1> -> vector<32x16xi1>
    %79 = tpu.concatenate %27, %36 in 0 : vector<16x16xf32>, vector<16x16xf32> -> vector<32x16xf32>
    %80 = arith.truncf %79 : vector<32x16xf32> to vector<32x16xbf16>
    %81 = arith.truncf %63 : vector<16x16xf32> to vector<16x16xbf16>
    %82 = tpu.transpose %81, [1, 0] : vector<16x16xbf16> -> vector<16x16xbf16>
    %cst_18 = arith.constant dense<0.000000e+00> : vector<32x16xf32>
    %83 = tpu.matmul %80, %82, %cst_18 {dimension_numbers = #tpu.dot_dimension_numbers<[1], [0], [0], [1], [0, 0, 1, 1], [], []>} : vector<32x16xbf16>, vector<16x16xbf16>, vector<32x16xf32> -> vector<32x16xf32>
    %cst_19 = arith.constant 2.500000e-01 : f32
    %84 = vector.broadcast %cst_19 : f32 to vector<32x16xf32>
    %85 = arith.mulf %83, %84 : vector<32x16xf32>
    %cst_20 = arith.constant 0xFF800000 : f32
    %86 = vector.broadcast %cst_20 : f32 to vector<32x16xf32>
    %87 = arith.select %78, %85, %86 : vector<32x16xi1>, vector<32x16xf32>
    %cst_21 = arith.constant dense<0xFF800000> : vector<32xf32>
    %88 = vector.multi_reduction <maximumf>, %87, %cst_21 [1] : vector<32x16xf32> to vector<32xf32>
    %89 = vector.shape_cast %88 : vector<32xf32> to vector<32x1xf32>
    %90 = vector.broadcast %89 : vector<32x1xf32> to vector<32x16xf32>
    %91 = arith.subf %87, %90 : vector<32x16xf32>
    %92 = math.exp %91 : vector<32x16xf32>
    %cst_22 = arith.constant dense<0.000000e+00> : vector<32xf32>
    %93 = vector.multi_reduction <add>, %92, %cst_22 [1] : vector<32x16xf32> to vector<32xf32>
    %94 = vector.shape_cast %93 : vector<32xf32> to vector<32x1xf32>
    %95 = tpu.reciprocal %94 {approx = true} : vector<32x1xf32> -> vector<32x1xf32>
    %96 = vector.broadcast %95 : vector<32x1xf32> to vector<32x16xf32>
    %97 = arith.mulf %92, %96 : vector<32x16xf32>
    %98 = arith.truncf %97 : vector<32x16xf32> to vector<32x16xbf16>
    %99 = arith.truncf %73 : vector<16x16xf32> to vector<16x16xbf16>
    %cst_23 = arith.constant dense<0.000000e+00> : vector<32x16xf32>
    %100 = tpu.matmul %98, %99, %cst_23 {dimension_numbers = #tpu.dot_dimension_numbers<[1], [0], [0], [1], [0, 0, 1, 1], [], []>} : vector<32x16xbf16>, vector<16x16xbf16>, vector<32x16xf32> -> vector<32x16xf32>
    %101 = vector.extract_strided_slice %100 {offsets = [0, 0], sizes = [16, 16], strides = [1, 1]} : vector<32x16xf32> to vector<16x16xf32>
    %102 = vector.extract_strided_slice %100 {offsets = [16, 0], sizes = [16, 16], strides = [1, 1]} : vector<32x16xf32> to vector<16x16xf32>
    %103 = tpu.concatenate %45, %54 in 0 : vector<16x16xf32>, vector<16x16xf32> -> vector<32x16xf32>
    %104 = arith.truncf %103 : vector<32x16xf32> to vector<32x16xbf16>
    %105 = arith.truncf %72 : vector<16x16xf32> to vector<16x16xbf16>
    %106 = tpu.transpose %105, [1, 0] : vector<16x16xbf16> -> vector<16x16xbf16>
    %cst_24 = arith.constant dense<0.000000e+00> : vector<32x16xf32>
    %107 = tpu.matmul %104, %106, %cst_24 {dimension_numbers = #tpu.dot_dimension_numbers<[1], [0], [0], [1], [0, 0, 1, 1], [], []>} : vector<32x16xbf16>, vector<16x16xbf16>, vector<32x16xf32> -> vector<32x16xf32>
    %cst_25 = arith.constant 2.500000e-01 : f32
    %108 = vector.broadcast %cst_25 : f32 to vector<32x16xf32>
    %109 = arith.mulf %107, %108 : vector<32x16xf32>
    %cst_26 = arith.constant 0xFF800000 : f32
    %110 = vector.broadcast %cst_26 : f32 to vector<32x16xf32>
    %111 = arith.select %78, %109, %110 : vector<32x16xi1>, vector<32x16xf32>
    %cst_27 = arith.constant dense<0xFF800000> : vector<32xf32>
    %112 = vector.multi_reduction <maximumf>, %111, %cst_27 [1] : vector<32x16xf32> to vector<32xf32>
    %113 = vector.shape_cast %112 : vector<32xf32> to vector<32x1xf32>
    %114 = vector.broadcast %113 : vector<32x1xf32> to vector<32x16xf32>
    %115 = arith.subf %111, %114 : vector<32x16xf32>
    %116 = math.exp %115 : vector<32x16xf32>
    %cst_28 = arith.constant dense<0.000000e+00> : vector<32xf32>
    %117 = vector.multi_reduction <add>, %116, %cst_28 [1] : vector<32x16xf32> to vector<32xf32>
    %118 = vector.shape_cast %117 : vector<32xf32> to vector<32x1xf32>
    %119 = tpu.reciprocal %118 {approx = true} : vector<32x1xf32> -> vector<32x1xf32>
    %120 = vector.broadcast %119 : vector<32x1xf32> to vector<32x16xf32>
    %121 = arith.mulf %116, %120 : vector<32x16xf32>
    %122 = arith.truncf %121 : vector<32x16xf32> to vector<32x16xbf16>
    %123 = arith.truncf %74 : vector<16x16xf32> to vector<16x16xbf16>
    %cst_29 = arith.constant dense<0.000000e+00> : vector<32x16xf32>
    %124 = tpu.matmul %122, %123, %cst_29 {dimension_numbers = #tpu.dot_dimension_numbers<[1], [0], [0], [1], [0, 0, 1, 1], [], []>} : vector<32x16xbf16>, vector<16x16xbf16>, vector<32x16xf32> -> vector<32x16xf32>
    %125 = vector.extract_strided_slice %124 {offsets = [0, 0], sizes = [16, 16], strides = [1, 1]} : vector<32x16xf32> to vector<16x16xf32>
    %126 = vector.extract_strided_slice %124 {offsets = [16, 0], sizes = [16, 16], strides = [1, 1]} : vector<32x16xf32> to vector<16x16xf32>
    %127 = tpu.concatenate %101, %102, %125, %126 in 1 : vector<16x16xf32>, vector<16x16xf32>, vector<16x16xf32>, vector<16x16xf32> -> vector<16x64xf32>
    %128 = arith.truncf %127 : vector<16x64xf32> to vector<16x64xbf16>
    %c0_30 = arith.constant 0 : index
    %c0_31 = arith.constant 0 : index
    %129 = vector.load %arg4[%c0_30, %c0_31] : memref<64x64xbf16, #tpu.memory_space<vmem>>, vector<64x64xbf16>
    %cst_32 = arith.constant dense<0.000000e+00> : vector<16x64xf32>
    %130 = tpu.matmul %128, %129, %cst_32 {dimension_numbers = #tpu.dot_dimension_numbers<[1], [0], [0], [1], [0, 0, 1, 1], [], []>} : vector<16x64xbf16>, vector<64x64xbf16>, vector<16x64xf32> -> vector<16x64xf32>
    %cst_33 = arith.constant 2.200000e-01 : f32
    %131 = vector.broadcast %cst_33 : f32 to vector<16x64xf32>
    %132 = arith.mulf %130, %131 : vector<16x64xf32>
    %133 = arith.addf %0, %132 : vector<16x64xf32>
    %134 = arith.mulf %133, %133 : vector<16x64xf32>
    %cst_34 = arith.constant dense<0.000000e+00> : vector<16xf32>
    %135 = vector.multi_reduction <add>, %134, %cst_34 [1] : vector<16x64xf32> to vector<16xf32>
    %136 = vector.shape_cast %135 : vector<16xf32> to vector<16x1xf32>
    %cst_35 = arith.constant 6.400000e+01 : f32
    %137 = vector.broadcast %cst_35 : f32 to vector<16x1xf32>
    %138 = arith.divf %136, %137 : vector<16x1xf32>
    %cst_36 = arith.constant 9.99999997E-7 : f32
    %139 = vector.broadcast %cst_36 : f32 to vector<16x1xf32>
    %140 = arith.addf %138, %139 : vector<16x1xf32>
    %141 = math.rsqrt %140 : vector<16x1xf32>
    %142 = vector.broadcast %141 : vector<16x1xf32> to vector<16x64xf32>
    %143 = arith.mulf %133, %142 : vector<16x64xf32>
    %c0_37 = arith.constant 0 : index
    %c0_38 = arith.constant 0 : index
    %144 = vector.load %arg2[%c0_37, %c0_38] : memref<1x64xf32, #tpu.memory_space<vmem>>, vector<1x64xf32>
    %145 = vector.broadcast %144 : vector<1x64xf32> to vector<16x64xf32>
    %146 = arith.mulf %143, %145 : vector<16x64xf32>
    %147 = arith.truncf %146 : vector<16x64xf32> to vector<16x64xbf16>
    %c0_39 = arith.constant 0 : index
    %c0_40 = arith.constant 0 : index
    %148 = vector.load %arg5[%c0_39, %c0_40] : memref<64x256xbf16, #tpu.memory_space<vmem>>, vector<64x256xbf16>
    %cst_41 = arith.constant dense<0.000000e+00> : vector<16x256xf32>
    %149 = tpu.matmul %147, %148, %cst_41 {dimension_numbers = #tpu.dot_dimension_numbers<[1], [0], [0], [1], [0, 0, 1, 1], [], []>} : vector<16x64xbf16>, vector<64x256xbf16>, vector<16x256xf32> -> vector<16x256xf32>
    %150 = vector.extract_strided_slice %149 {offsets = [0, 0], sizes = [16, 128], strides = [1, 1]} : vector<16x256xf32> to vector<16x128xf32>
    %151 = vector.extract_strided_slice %149 {offsets = [0, 128], sizes = [16, 128], strides = [1, 1]} : vector<16x256xf32> to vector<16x128xf32>
    %152 = arith.negf %150 : vector<16x128xf32>
    %153 = math.exp %152 : vector<16x128xf32>
    %cst_42 = arith.constant 1.000000e+00 : f32
    %154 = vector.broadcast %cst_42 : f32 to vector<16x128xf32>
    %155 = arith.addf %154, %153 : vector<16x128xf32>
    %156 = arith.divf %154, %155 : vector<16x128xf32>
    %157 = arith.mulf %150, %156 : vector<16x128xf32>
    %158 = arith.mulf %157, %151 : vector<16x128xf32>
    %159 = arith.truncf %158 : vector<16x128xf32> to vector<16x128xbf16>
    %c0_43 = arith.constant 0 : index
    %c0_44 = arith.constant 0 : index
    %160 = vector.load %arg6[%c0_43, %c0_44] : memref<128x64xbf16, #tpu.memory_space<vmem>>, vector<128x64xbf16>
    %cst_45 = arith.constant dense<0.000000e+00> : vector<16x64xf32>
    %161 = tpu.matmul %159, %160, %cst_45 {dimension_numbers = #tpu.dot_dimension_numbers<[1], [0], [0], [1], [0, 0, 1, 1], [], []>} : vector<16x128xbf16>, vector<128x64xbf16>, vector<16x64xf32> -> vector<16x64xf32>
    %cst_46 = arith.constant 2.200000e-01 : f32
    %162 = vector.broadcast %cst_46 : f32 to vector<16x64xf32>
    %163 = arith.mulf %161, %162 : vector<16x64xf32>
    %164 = arith.addf %133, %163 : vector<16x64xf32>
    %165 = tpu.concatenate %164, %133 in 1 : vector<16x64xf32>, vector<16x64xf32> -> vector<16x128xf32>
    %c0_47 = arith.constant 0 : index
    %c0_48 = arith.constant 0 : index
    %166 = vector.load %arg9[%c0_47, %c0_48] : memref<16x128xf32, #tpu.memory_space<vmem>>, vector<16x128xf32>
    tpu.vector_store %arg9[%c0_47, %c0_48], %165 {strides = array<i32>} : memref<16x128xf32, #tpu.memory_space<vmem>>, vector<16x128xf32>,
    return
  }
}

</mosaic_0001>

<bundles_post_ra>
// kernel: tpu_custom_call.1
= control target key start
LH: loop header
LB: loop body
LE: loop exit
PB: predicated region body
PF: predicated region fallthrough
CT: control target
= control target key end

     0   :  { %14 = vsyncpa [#allocation3], 0  ;;  %s1938_s0 = inlined_call_operand.hbm [shape: f32[16,64], index: 0, kind: input, shape index: {}]   ;;  %s1939_s1 = inlined_call_operand.vmem [shape: f32[1,64], index: 1, kind: input, shape index: {}]   ;;  %s1940_s2 = inlined_call_operand.vmem [shape: f32[1,64], index: 2, kind: input, shape index: {}]   ;;  %s1941_s3 = inlined_call_operand.vmem [shape: bf16[64,128], index: 3, kind: input, shape index: {}]   ;;  %s1942_s4 = inlined_call_operand.hbm [shape: bf16[64,64], index: 4, kind: input, shape index: {}]   ;;  %s1943_s5 = inlined_call_operand.vmem [shape: bf16[64,256], index: 5, kind: input, shape index: {}]   ;;  %s1944_s6 = inlined_call_operand.vmem [shape: bf16[128,64], index: 6, kind: input, shape index: {}]   ;;  %s1945_s7 = inlined_call_operand.hbm [shape: f32[16,16], index: 7, kind: input, shape index: {}]   ;;  %s1946_s8 = inlined_call_operand.hbm [shape: f32[16,16], index: 8, kind: input, shape index: {}]   ;;  %s1947_s9 = inlined_call_operand.hbm [shape: f32[16,128], index: 9, kind: output, shape index: {}]  }
   0x1   :  { %15 = vsyncpa [#allocation6], 0 }
   0x2   :  { %16 = vsyncpa [#allocation9], 0 }
   0x3   :  { %17 = vsyncpa [#allocation4], 0  ;;  %s1545_s30 = smov [#allocation5]  }
   0x4   :  { %s41_s10 = sshll.u32 %s1545_s30, 4  ;;  %s42_s10 = int_to_ptr.vmem [resolvable:$true] %s41_s10 }
   0x5   :  { %s1445_s11 = scalar_lea.vmem %s42_s10, 512  ;;  %p1450_p1 = scmp.lt.s32.totalorder %s42_s10, %s42_s10 }
   0x6   :  { %p1446_p0 = scmp.ne.s32.totalorder %s42_s10, %s1445_s11  ;;  %p1451_p2 = scmp.lt.s32.totalorder %s1445_s11, %s1445_s11 }
   0x8   :  { %p1452_p3 = por %p1451_p2, %p1450_p1 }
   0xa   :  { %p1453_p4 = pnand %p1452_p3, %p1446_p0 }
   0xc   :  { %1456 = shalt.err (!%p1453_p4)
}
   0xd   :  { %s1546_s12 = smov 64   ;;  %s1547_s13 = smov 4  }
   0xe   :  { %47 = dma.hbm_to_vmem [thread:$0]  %s1942_s4, 512, %s42_s10, [#allocation6], %s1546_s12, %s1546_s12, %s1547_s13  }
   0xf   :  { %s1548_s16 = smov [#allocation2]  }
  0x10   :  { %s23_s17 = sshll.u32 %s1548_s16, 4  ;;  %s24_s17 = int_to_ptr.vmem [resolvable:$true] %s23_s17 }
  0x11   :  { %s1465_s18 = scalar_lea.vmem %s24_s17, 256  ;;  %p1470_p6 = scmp.lt.s32.totalorder %s24_s17, %s24_s17 }
  0x12   :  { %p1466_p5 = scmp.ne.s32.totalorder %s24_s17, %s1465_s18  ;;  %p1471_p7 = scmp.lt.s32.totalorder %s1465_s18, %s1465_s18 }
  0x14   :  { %p1472_p8 = por %p1471_p7, %p1470_p6 }
  0x16   :  { %p1473_p9 = pnand %p1472_p8, %p1466_p5 }
  0x18   :  { %1476 = shalt.err (!%p1473_p9)
}
  0x19   :  { %s1549_s19 = smov 128   ;;  %s1550_s20 = smov 8  }
  0x1a   :  { %29 = dma.hbm_to_vmem [thread:$0]  %s1938_s0, 256, %s24_s17, [#allocation3], %s1549_s19, %s1549_s19, %s1550_s20  }
  0x1b   :  { %s1551_s4 = smov [#allocation7]   ;;  %s1552_s24 = smov [#allocation8]  }
  0x1c   :  { %s57_s23 = sshll.u32 %s1551_s4, 4  ;;  %s69_s25 = sshll.u32 %s1552_s24, 4  ;;  %s58_s23 = int_to_ptr.vmem [resolvable:$true] %s57_s23  ;;  %s70_s25 = int_to_ptr.vmem [resolvable:$true] %s69_s25 }
  0x1d   :  { %s1485_s26 = scalar_lea.vmem %s58_s23, 256  ;;  %p1490_p11 = scmp.lt.s32.totalorder %s58_s23, %s58_s23 }
  0x1e   :  { %p1486_p10 = scmp.ne.s32.totalorder %s58_s23, %s1485_s26  ;;  %p1491_p12 = scmp.lt.s32.totalorder %s1485_s26, %s1485_s26 }
  0x20   :  { %p1492_p13 = por %p1491_p12, %p1490_p11 }
  0x22   :  { %p1493_p0 = pnand %p1492_p13, %p1486_p10 }
  0x24   :  { %1496 = shalt.err (!%p1493_p0)
}
  0x25   :  { %63 = dma.hbm_to_vmem [thread:$0]  %s1945_s7, 256, %s58_s23, [#allocation6], %s1549_s19, %s1549_s19, %s1550_s20  }
  0x26   :  { %s1505_s0 = scalar_lea.vmem %s70_s25, 256  ;;  %p1510_p2 = scmp.lt.s32.totalorder %s70_s25, %s70_s25 }
  0x27   :  { %p1506_p1 = scmp.ne.s32.totalorder %s70_s25, %s1505_s0  ;;  %p1511_p3 = scmp.lt.s32.totalorder %s1505_s0, %s1505_s0 }
  0x29   :  { %p1512_p4 = por %p1511_p3, %p1510_p2 }
  0x2b   :  { %p1513_p5 = pnand %p1512_p4, %p1506_p1 }
  0x2d   :  { %1516 = shalt.err (!%p1513_p5)
}
  0x2e   :  { %75 = dma.hbm_to_vmem [thread:$0]  %s1946_s8, 256, %s70_s25, [#allocation9], %s1549_s19, %s1549_s19, %s1550_s20  }
  0x2f   :  { %1537 = dma.done.wait [#allocation3], 256  }
  0x30   :  { %1538 = vsyncadd [#allocation3], 4294967040 }
  0x31   :  { %1539 = dma.done.wait [#allocation6], 768  }
  0x32   :  { %1540 = vsyncadd [#allocation6], 4294966528 }
  0x33   :  { %1541 = dma.done.wait [#allocation9], 256  }
  0x34   :  { %1542 = vsyncadd [#allocation9], 4294967040  ;;  %v1642_v0 = vld [vmem:[#allocation2] sm:$0xff]  ;;  %vm93_vm0 = vcmask 523264   ;;  %v1644_v1 = vld [vmem:[#allocation2 + $0x8] sm:$0xff]  ;;  %v1553_v7 = vmov 0.0  }
  0x35   :  { %v91_v2 = vmul.f32 %v1642_v0, %v1642_v0  ;;  %v92_v3 = vmul.f32 %v1644_v1, %v1644_v1  ;;  %v1361_v6 = vld [vmem:[%s1941_s3 + $0x18] sm:$0xff]   ;;  %1242 = vmatprep.subr.bf16.mxu1 %v1553_v7  ;;  %vm1554_vm1 = vmmov 0   ;;  %v1362_v8 = vld [vmem:[%s1941_s3 + $0x10] sm:$0xff]   ;;  %v1363_v9 = vld [vmem:[%s1941_s3 + $0x8] sm:$0xff]   ;;  %s1556_s21 = smov 72   ;;  %s1558_s22 = smov 56  }
  0x36   :  { %1250 = vmatprep.mubr.msk.bf16.mxu1 %vm1554_vm1, %v1553_v7  ;;  %1243 = vmatpush3.bf16.msra.mxu1 %v1361_v6  ;;  %v1364_v10 = vld [vmem:[%s1941_s3] sm:$0xff]   ;;  %s1555_s3 = smov 88   ;;  %s1559_s4 = smov 104   ;;  %v1701_v31 = vld [vmem:[#allocation7 + $0x8] sm:$0xff]  ;;  %v1716_v32 = vld [vmem:[#allocation7] sm:$0xff]  ;;  %vm217_vm2 = vcmask 64512  }
  0x37   :  { %v94_v4 = vsel %vm93_vm0, %v91_v2, 0.0  ;;  %v97_v5 = vsel %vm93_vm0, %v92_v3, 0.0  ;;  %1244 = vmatprep.subr.bf16.mxu1 %v1553_v7  ;;  %v1172_v20 = vld [vmem:[%s1939_s1] ss:$0 sm:$0xff]  ;;  %s1557_s1 = smov 120   ;;  %s1560_s23 = smov 40  }
  0x38   :  { %95 = vadd.xlane.f32.xlu0 %v94_v4  ;;  %s1561_s24 = smov 48   ;;  %v1720_v33 = vld [vmem:[#allocation8] sm:$0xff]  ;;  %v1725_v39 = vld [vmem:[#allocation8 + $0x8] sm:$0xff]  ;;  %s1562_s25 = smov 16   ;;  %vm419_vm3 = vcmask 130048   ;;  %vm808_vm6 = vcmask 261120  }
  0x39   :  { %s1563_s26 = smov 80   ;;  %s1564_s27 = smov 32   ;;  %vm811_vm7 = vcmask 392192  }
  0x3a   :  { %1245 = vmatpush3.bf16.msra.mxu1 %v1362_v8  ;;  %s1565_s28 = smov 112   ;;  %s1566_s0 = smov 96  }
  0x3b   :  { %1246 = vmatprep.subr.bf16.mxu1 %v1553_v7 }
  0x3c   :  { %98 = vadd.xlane.f32.xlu0 %v97_v5 }
  0x3e   :  { %1247 = vmatpush3.bf16.msra.mxu1 %v1363_v9 }
  0x3f   :  { %1248 = vmatprep.subr.bf16.mxu1 %v1553_v7 }
  0x42   :  { %1249 = vmatpush3.bf16.msra.mxu1 %v1364_v10 }
  0xc1   :  { %v96_v11 = vpop.xlane.xlu0 %95 }
  0xc2   :  { %v101_v12 = vmul.f32 0.015625, %v96_v11 }
  0xc4   :  { %v103_v13 = vadd.f32 1e-06, %v101_v12 }
  0xc5   :  { %v99_v14 = vpop.xlane.xlu0 %98 }
  0xc6   :  { %1389 = vrsqrt.f32 %v103_v13  ;;  %v102_v15 = vmul.f32 0.015625, %v99_v14 }
  0xc8   :  { %v104_v16 = vadd.f32 1e-06, %v102_v15 }
  0xca   :  { %1391 = vrsqrt.f32 %v104_v16 }
  0xd3   :  { %v1390_v17 = vpop.eup %1389 }
  0xd4   :  { %v107_v18 = vmul.f32 %v1390_v17, %v1642_v0 }
  0xd6   :  { %v116_v22 = vmul.f32 %v1172_v20, %v107_v18 }
  0xd7   :  { %v1392_v19 = vpop.eup %1391 }
  0xd8   :  { %v108_v21 = vmul.f32 %v1392_v19, %v1644_v1 }
  0xda   :  { %v117_v23 = vmul.f32 %v1172_v20, %v108_v21 }
  0xdc   :  { %v118_v24 = vpack.c.bf16 %v117_v23, %v116_v22 }
  0xde   :  { %1251 = vmatmul.mubr.msk.bf16.vlgmr.msra.gmra.mxu1 %vm93_vm0, %v118_v24 }
 0x19e   :  { %v1676_v25 = vpop.f32.mrf.mxu1 }
 0x19f   :  { %302 = vrot.lane.b32.xlu0 %v1676_v25, %s1555_s3  ;;  %v1681_v26 = vsub.f32 0.0, %v1676_v25 }
 0x1a0   :  { %v1252_v27 = vpop.f32.mrf.mxu1 }
 0x1a1   :  { %296 = vrot.lane.b32.xlu1 %v1681_v26, %s1556_s21 }
 0x1a2   :  { %v1684_v28 = vpop.f32.mrf.mxu1 }
 0x1a3   :  { %234 = vrot.lane.b32.xlu0 %v1684_v28, %s1557_s1  ;;  %v1689_v29 = vsub.f32 0.0, %v1684_v28 }
 0x1a4   :  { %v1253_v30 = vpop.f32.mrf.mxu1 }
 0x1a5   :  { %298 = vrot.lane.b32.xlu1 %v1689_v29, %s1556_s21 }
 0x1a7   :  { %372 = vrot.lane.b32.xlu0 %v1684_v28, %s1558_s22 }
 0x1a9   :  { %304 = vrot.lane.b32.xlu1 %v1684_v28, %s1555_s3 }
 0x1ab   :  { %270 = vrot.lane.b32.xlu0 %v1684_v28, %s1559_s4 }
 0x1ad   :  { %330 = vrot.lane.b32.xlu1 %v1681_v26, %s1558_s22 }
 0x1af   :  { %228 = vrot.lane.b32.xlu0 %v1689_v29, %s1559_s4 }
 0x1b1   :  { %336 = vrot.lane.b32.xlu1 %v1676_v25, %s1556_s21 }
 0x1b3   :  { %366 = vrot.lane.b32.xlu0 %v1689_v29, %s1560_s23 }
 0x1b5   :  { %338 = vrot.lane.b32.xlu1 %v1684_v28, %s1556_s21 }
 0x1b7   :  { %312 = vrot.lane.b32.xlu0 %v1701_v31, %s1561_s24 }
 0x1b9   :  { %226 = vrot.lane.b32.xlu1 %v1681_v26, %s1559_s4 }
 0x1bb   :  { %264 = vrot.lane.b32.xlu0 %v1689_v29, %s1555_s3 }
 0x1bd   :  { %232 = vrot.lane.b32.xlu1 %v1676_v25, %s1557_s1 }
 0x1c1   :  { %364 = vrot.lane.b32.xlu1 %v1681_v26, %s1560_s23 }
 0x1c5   :  { %332 = vrot.lane.b32.xlu1 %v1689_v29, %s1558_s22 }
 0x1c9   :  { %370 = vrot.lane.b32.xlu1 %v1676_v25, %s1558_s22 }
 0x1cd   :  { %262 = vrot.lane.b32.xlu1 %v1681_v26, %s1555_s3 }
 0x1d1   :  { %268 = vrot.lane.b32.xlu1 %v1676_v25, %s1559_s4 }
 0x1d5   :  { %310 = vrot.lane.b32.xlu1 %v1716_v32, %s1561_s24 }
 0x211   :  { %v303_v34 = vpop.permute.xlu0 %302 }
 0x213   :  { %v297_v35 = vpop.permute.xlu1 %296 }
 0x214   :  { %v308_v36 = vsel %vm217_vm2, %v297_v35, %v303_v34 }
 0x215   :  { %v318_v37 = vmul.f32 %v308_v36, %v1720_v33  ;;  %v235_v43 = vpop.permute.xlu0 %234 }
 0x217   :  { %322 = vrot.lane.b32.xlu1 %v318_v37, %s1561_s24  ;;  %v299_v38 = vpop.permute.xlu1 %298 }
 0x219   :  { %v373_v47 = vpop.permute.xlu0 %372 }
 0x21b   :  { %344 = vrot.lane.b32.xlu1 %v1716_v32, %s1546_s12  ;;  %v305_v40 = vpop.permute.xlu1 %304 }
 0x21c   :  { %v309_v41 = vsel %vm217_vm2, %v299_v38, %v305_v40 }
 0x21d   :  { %v319_v42 = vmul.f32 %v309_v41, %v1725_v39  ;;  %v271_v50 = vpop.permute.xlu0 %270 }
 0x21f   :  { %324 = vrot.lane.b32.xlu0 %v319_v42, %s1561_s24  ;;  %v331_v44 = vpop.permute.xlu1 %330 }
 0x221   :  { %v229_v54 = vpop.permute.xlu0 %228 }
 0x222   :  { %v239_v61 = vsel %vm217_vm2, %v229_v54, %v235_v43 }
 0x223   :  { %346 = vrot.lane.b32.xlu0 %v1701_v31, %s1546_s12  ;;  %v337_v45 = vpop.permute.xlu1 %336  ;;  %v251_v2 = vmul.f32 %v239_v61, %v1725_v39 }
 0x224   :  { %v342_v46 = vsel %vm217_vm2, %v331_v44, %v337_v45 }
 0x225   :  { %v352_v48 = vmul.f32 %v342_v46, %v1720_v33  ;;  %v367_v57 = vpop.permute.xlu0 %366 }
 0x226   :  { %v377_v5 = vsel %vm217_vm2, %v367_v57, %v373_v47 }
 0x227   :  { %244 = vrot.lane.b32.xlu0 %v1701_v31, %s1562_s25  ;;  %356 = vrot.lane.b32.xlu1 %v352_v48, %s1546_s12  ;;  %v339_v49 = vpop.permute.xlu1 %338  ;;  %v387_v8 = vmul.f32 %v377_v5, %v1725_v39 }
 0x229   :  { %v313_v3 = vpop.permute.xlu0 %312 }
 0x22a   :  { %v317_v17 = vmul.f32 %v313_v3, %v1684_v28 }
 0x22b   :  { %380 = vrot.lane.b32.xlu0 %v1701_v31, %s1563_s26  ;;  %242 = vrot.lane.b32.xlu1 %v1716_v32, %s1562_s25  ;;  %v227_v51 = vpop.permute.xlu1 %226 }
 0x22d   :  { %v265_v9 = vpop.permute.xlu0 %264 }
 0x22e   :  { %v275_v13 = vsel %vm217_vm2, %v265_v9, %v271_v50 }
 0x22f   :  { %378 = vrot.lane.b32.xlu1 %v1716_v32, %s1563_s26  ;;  %v233_v52 = vpop.permute.xlu1 %232  ;;  %v285_v14 = vmul.f32 %v275_v13, %v1725_v39 }
 0x230   :  { %v238_v53 = vsel %vm217_vm2, %v227_v51, %v233_v52 }
 0x231   :  { %v250_v55 = vmul.f32 %v238_v53, %v1720_v33 }
 0x233   :  { %254 = vrot.lane.b32.xlu1 %v250_v55, %s1562_s25  ;;  %v365_v56 = vpop.permute.xlu1 %364 }
 0x237   :  { %v333_v58 = vpop.permute.xlu1 %332 }
 0x238   :  { %v343_v59 = vsel %vm217_vm2, %v333_v58, %v339_v49 }
 0x239   :  { %v353_v60 = vmul.f32 %v343_v59, %v1725_v39 }
 0x23b   :  { %358 = vrot.lane.b32.xlu0 %v353_v60, %s1546_s12  ;;  %v371_v62 = vpop.permute.xlu1 %370 }
 0x23c   :  { %v376_v63 = vsel %vm217_vm2, %v365_v56, %v371_v62 }
 0x23d   :  { %v386_v4 = vmul.f32 %v376_v63, %v1720_v33 }
 0x23f   :  { %256 = vrot.lane.b32.xlu0 %v251_v2, %s1562_s25  ;;  %390 = vrot.lane.b32.xlu1 %v386_v4, %s1563_s26  ;;  %v263_v6 = vpop.permute.xlu1 %262 }
 0x243   :  { %392 = vrot.lane.b32.xlu0 %v387_v8, %s1563_s26  ;;  %276 = vrot.lane.b32.xlu1 %v1716_v32, %s1564_s27  ;;  %v269_v10 = vpop.permute.xlu1 %268 }
 0x244   :  { %v274_v11 = vsel %vm217_vm2, %v263_v6, %v269_v10 }
 0x245   :  { %v284_v12 = vmul.f32 %v274_v11, %v1720_v33 }
 0x247   :  { %278 = vrot.lane.b32.xlu0 %v1701_v31, %s1564_s27  ;;  %288 = vrot.lane.b32.xlu1 %v284_v12, %s1564_s27  ;;  %v311_v15 = vpop.permute.xlu1 %310 }
 0x248   :  { %v316_v18 = vmul.f32 %v311_v15, %v1676_v25  ;;  %v220_v15 = vmul.f32 %v1716_v32, %v1676_v25 }
 0x24b   :  { %290 = vrot.lane.b32.xlu0 %v285_v14, %s1564_s27 }
 0x24f   :  { %203 = vrot.lane.b32.xlu0 %v1681_v26, %s1557_s1 }
 0x253   :  { %211 = vrot.lane.b32.xlu0 %v1676_v25, %s1550_s20 }
 0x289   :  { %v323_v16 = vpop.permute.xlu1 %322 }
 0x28a   :  { %v328_v20 = vadd.f32 %v323_v16, %v316_v18  ;;  %v221_v16 = vmul.f32 %v1701_v31, %v1684_v28 }
 0x28d   :  { %v345_v23 = vpop.permute.xlu1 %344 }
 0x28e   :  { %v350_v36 = vmul.f32 %v345_v23, %v1676_v25 }
 0x291   :  { %v325_v19 = vpop.permute.xlu0 %324 }
 0x292   :  { %v329_v21 = vadd.f32 %v325_v19, %v317_v17 }
 0x294   :  { %v1336_v22 = vpack.i.bf16 %v329_v21, %v328_v20 }
 0x295   :  { %v347_v26 = vpop.permute.xlu0 %346 }
 0x296   :  { %1337 = vrot.lane.b32.xlu1 %v1336_v22, %s1565_s28  ;;  %v351_v37 = vmul.f32 %v347_v26, %v1684_v28 }
 0x299   :  { %v357_v24 = vpop.permute.xlu1 %356  ;;  %v245_v30 = vpop.permute.xlu0 %244 }
 0x29a   :  { %205 = vrot.lane.b32.xlu1 %v1689_v29, %s1557_s1  ;;  %v362_v41 = vadd.f32 %v357_v24, %v350_v36  ;;  %v249_v43 = vmul.f32 %v245_v30, %v1684_v28  ;;  %v398_v30 = vlaneseq }
 0x29c   :  { %v402_v36 = vand.u32 127, %v398_v30 }
 0x29d   :  { %v243_v27 = vpop.permute.xlu1 %242  ;;  %v381_v35 = vpop.permute.xlu0 %380 }
 0x29e   :  { %213 = vrot.lane.b32.xlu1 %v1684_v28, %s1550_s20  ;;  %v248_v29 = vmul.f32 %v243_v27, %v1676_v25  ;;  %v385_v49 = vmul.f32 %v381_v35, %v1684_v28 }
 0x2a1   :  { %v379_v34 = vpop.permute.xlu1 %378 }
 0x2a2   :  { %v384_v50 = vmul.f32 %v379_v34, %v1676_v25  ;;  %v399_v34 = vshrl.u32 %v398_v30, 7 }
 0x2a4   :  { %vm403_vm4 = vcmp.le.s32.totalorder %v402_v36, %v399_v34 }
 0x2a5   :  { %v255_v38 = vpop.permute.xlu1 %254 }
 0x2a6   :  { %v260_v47 = vadd.f32 %v255_v38, %v248_v29 }
 0x2ad   :  { %v359_v40 = vpop.permute.xlu0 %358 }
 0x2ae   :  { %v363_v42 = vadd.f32 %v359_v40, %v351_v37  ;;  %v400_v37 = vadd.s32 8, %v399_v34 }
 0x2b0   :  { %v415_v44 = vpack.c.bf16 %v363_v42, %v362_v41  ;;  %vm404_vm5 = vcmp.le.s32.totalorder %v402_v36, %v400_v37 }
 0x2b1   :  { %v257_v45 = vpop.permute.xlu0 %256  ;;  %v391_v46 = vpop.permute.xlu1 %390 }
 0x2b2   :  { %v261_v48 = vadd.f32 %v257_v45, %v249_v43  ;;  %417 = vrot.lane.b32.xlu0 %v415_v44, %s1546_s12  ;;  %v396_v54 = vadd.f32 %v391_v46, %v384_v50 }
 0x2b4   :  { %v1341_v51 = vpack.i.bf16 %v261_v48, %v260_v47 }
 0x2b5   :  { %v393_v52 = vpop.permute.xlu0 %392  ;;  %v277_v53 = vpop.permute.xlu1 %276 }
 0x2b6   :  { %v397_v55 = vadd.f32 %v393_v52, %v385_v49  ;;  %1342 = vrot.lane.b32.xlu1 %v1341_v51, %s1565_s28  ;;  %v282_v59 = vmul.f32 %v277_v53, %v1676_v25 }
 0x2b8   :  { %v602_v56 = vpack.c.bf16 %v397_v55, %v396_v54 }
 0x2b9   :  { %v279_v57 = vpop.permute.xlu0 %278  ;;  %v289_v58 = vpop.permute.xlu1 %288 }
 0x2ba   :  { %610 = vrot.lane.b32.xlu0 %v602_v56, %s1561_s24  ;;  %v283_v60 = vmul.f32 %v279_v57, %v1684_v28  ;;  %v294_v62 = vadd.f32 %v289_v58, %v282_v59 }
 0x2bd   :  { %v291_v61 = vpop.permute.xlu0 %290 }
 0x2be   :  { %v295_v63 = vadd.f32 %v291_v61, %v283_v60 }
 0x2c0   :  { %v600_v2 = vpack.c.bf16 %v295_v63, %v294_v62 }
 0x2c1   :  { %v204_v3 = vpop.permute.xlu0 %203 }
 0x2c2   :  { %605 = vrot.lane.b32.xlu1 %v600_v2, %s1566_s0 }
 0x2c5   :  { %v212_v8 = vpop.permute.xlu0 %211 }
 0x2c6   :  { %v218_v11 = vsel %vm217_vm2, %v204_v3, %v212_v8 }
 0x2c7   :  { %v222_v12 = vmul.f32 %v218_v11, %v1720_v33 }
 0x2c9   :  { %v224_v18 = vadd.f32 %v222_v12, %v220_v15 }
 0x308   :  { %v1338_v4 = vpop.permute.xlu1 %1337 }
 0x309   :  { %v1340_v5 = vunpack.i.h.bf16 %v1338_v4  ;;  %v1339_v6 = vunpack.i.l.bf16 %v1338_v4 }
 0x30b   :  { %v601_v9 = vpack.c.bf16 %v1340_v5, %v1339_v6 }
 0x30c   :  { %v206_v10 = vpop.permute.xlu1 %205 }
 0x30d   :  { %607 = vrot.lane.b32.xlu0 %v601_v9, %s1566_s0 }
 0x310   :  { %v214_v13 = vpop.permute.xlu1 %213 }
 0x311   :  { %v219_v14 = vsel %vm217_vm2, %v206_v10, %v214_v13 }
 0x312   :  { %v223_v17 = vmul.f32 %v219_v14, %v1725_v39 }
 0x314   :  { %v225_v19 = vadd.f32 %v223_v17, %v221_v16 }
 0x316   :  { %v413_v20 = vpack.c.bf16 %v225_v19, %v224_v18 }
 0x318   :  { %1256 = vmatprep.mubr.msk.bf16.mxu1 %vm419_vm3, %v413_v20 }
 0x324   :  { %v418_v21 = vpop.permute.xlu0 %417 }
 0x325   :  { %v427_v33 = vsel %vm419_vm3, %v418_v21, 0  ;;  %1310 = vmatprep.subr.msk.bf16.mxu1 %vm419_vm3, %v418_v21 }
 0x326   :  { %1255 = vmatpush3.bf16.xpose.msra.mxu1 %v427_v33 }
 0x328   :  { %v1343_v22 = vpop.permute.xlu1 %1342 }
 0x329   :  { %v1345_v23 = vunpack.i.h.bf16 %v1343_v22  ;;  %v1344_v32 = vunpack.i.l.bf16 %v1343_v22 }
 0x32b   :  { %v414_v24 = vpack.c.bf16 %v1345_v23, %v1344_v32 }
 0x32c   :  { %v611_v26 = vpop.permute.xlu0 %610 }
 0x32d   :  { %1257 = vmatmul.mubr.msk.bf16.vlgmr.msra.gmra.mxu1 %vm419_vm3, %v414_v24  ;;  %1311 = vmatprep.subr.msk.bf16.mxu0 %vm419_vm3, %v611_v26  ;;  %v619_v31 = vsel %vm419_vm3, %v611_v26, 0 }
 0x32e   :  { %1267 = vmatpush3.bf16.xpose.msra.mxu0 %v619_v31 }
 0x32f   :  { %1278 = vmatprep.subr.bf16.mxu0 %v1553_v7 }
 0x334   :  { %v606_v39 = vpop.permute.xlu1 %605 }
 0x335   :  { %1268 = vmatprep.mubr.msk.bf16.mxu0 %vm419_vm3, %v606_v39 }
 0x37f   :  { %v608_v27 = vpop.permute.xlu0 %607 }
 0x380   :  { %1269 = vmatmul.mubr.msk.bf16.vlgmr.msra.gmra.mxu0 %vm419_vm3, %v608_v27 }
 0x381   :  { %1286 = vmatprep.mubr.msk.bf16.mxu0 %vm1554_vm1, %v1553_v7 }
 0x3ed   :  { %v1258_v35 = vpop.f32.mrf.mxu1 }
 0x3ee   :  { %v480_v45 = vmul.f32 0.25, %v1258_v35 }
 0x3ef   :  { %v463_v38 = vpop.f32.mrf.mxu1 }
 0x3f0   :  { %v478_v40 = vmul.f32 0.25, %v463_v38  ;;  %v484_v51 = vsel %vm403_vm4, %v480_v45, -inf }
 0x3f1   :  { %v1259_v41 = vpop.f32.mrf.mxu1  ;;  %v492_v52 = vsel %vm419_vm3, %v484_v51, -inf }
 0x3f2   :  { %v481_v42 = vmul.f32 0.25, %v1259_v41  ;;  %v482_v43 = vsel %vm403_vm4, %v478_v40, -inf }
 0x3f3   :  { %v466_v29 = vpop.f32.mrf.mxu1  ;;  %v486_v44 = vsel %vm419_vm3, %v482_v43, -inf }
 0x3f4   :  { %v479_v46 = vmul.f32 0.25, %v466_v29  ;;  %487 = vmax.xlane.f32.xlu1 %v486_v44  ;;  %v485_v47 = vsel %vm404_vm5, %v481_v42, -inf }
 0x3f5   :  { %v495_v49 = vsel %vm419_vm3, %v485_v47, -inf }
 0x3f6   :  { %v483_v48 = vsel %vm404_vm5, %v479_v46, -inf }
 0x3f7   :  { %v489_v50 = vsel %vm419_vm3, %v483_v48, -inf }
 0x3f8   :  { %496 = vmax.xlane.f32.xlu1 %v495_v49  ;;  %490 = vmax.xlane.f32.xlu0 %v489_v50  ;;  %v532_v50 = vpack.c.bf16 %v1684_v28, %v1676_v25 }
 0x3fc   :  { %493 = vmax.xlane.f32.xlu0 %v492_v52 }
 0x440   :  { %v1270_v53 = vpop.f32.mrf.mxu0 }
 0x441   :  { %v672_v55 = vmul.f32 0.25, %v1270_v53 }
 0x442   :  { %v655_v54 = vpop.f32.mrf.mxu0 }
 0x443   :  { %v670_v56 = vmul.f32 0.25, %v655_v54  ;;  %v676_v63 = vsel %vm403_vm4, %v672_v55, -inf }
 0x444   :  { %v1271_v57 = vpop.f32.mrf.mxu0  ;;  %v684_v4 = vsel %vm419_vm3, %v676_v63, -inf }
 0x445   :  { %v674_v58 = vsel %vm403_vm4, %v670_v56, -inf  ;;  %v673_v61 = vmul.f32 0.25, %v1271_v57 }
 0x446   :  { %v658_v59 = vpop.f32.mrf.mxu0  ;;  %v678_v60 = vsel %vm419_vm3, %v674_v58, -inf }
 0x447   :  { %v671_v62 = vmul.f32 0.25, %v658_v59  ;;  %679 = vmax.xlane.f32.xlu0 %v678_v60  ;;  %v677_v5 = vsel %vm404_vm5, %v673_v61, -inf }
 0x448   :  { %v687_v6 = vsel %vm419_vm3, %v677_v5, -inf }
 0x449   :  { %v675_v2 = vsel %vm404_vm5, %v671_v62, -inf }
 0x44a   :  { %v681_v3 = vsel %vm419_vm3, %v675_v2, -inf }
 0x44b   :  { %682 = vmax.xlane.f32.xlu1 %v681_v3  ;;  %685 = vmax.xlane.f32.xlu0 %v684_v4 }
 0x44f   :  { %688 = vmax.xlane.f32.xlu1 %v687_v6 }
 0x47d   :  { %v488_v8 = vpop.xlane.xlu1 %487 }
 0x47e   :  { %v498_v13 = vsub.f32 %v482_v43, %v488_v8 }
 0x480   :  { %v502_v18 = vmul.f32 1.442695, %v498_v13 }
 0x481   :  { %v497_v9 = vpop.xlane.xlu1 %496  ;;  %v491_v10 = vpop.xlane.xlu0 %490 }
 0x482   :  { %v501_v11 = vsub.f32 %v485_v47, %v497_v9  ;;  %v499_v12 = vsub.f32 %v483_v48, %v491_v10 }
 0x484   :  { %v508_v14 = vmul.f32 1.442695, %v501_v11  ;;  %v504_v15 = vmul.f32 1.442695, %v499_v12 }
 0x485   :  { %v494_v16 = vpop.xlane.xlu0 %493 }
 0x486   :  { %1393 = vpow2.f32 %v508_v14  ;;  %v500_v17 = vsub.f32 %v484_v51, %v494_v16 }
 0x487   :  { %1395 = vpow2.f32 %v504_v15 }
 0x488   :  { %v506_v19 = vmul.f32 1.442695, %v500_v17 }
 0x48a   :  { %1397 = vpow2.f32 %v506_v19  ;;  %v1366_v19 = vld [vmem:[#allocation5 + $0x10] sm:$0xff]  }
 0x48b   :  { %1399 = vpow2.f32 %v502_v18  ;;  %v1365_v18 = vld [vmem:[#allocation5 + $0x18] sm:$0xff]  }
 0x48c   :  { %1279 = vmatpush3.bf16.msra.mxu0 %v1365_v18 }
 0x48d   :  { %1280 = vmatprep.subr.bf16.mxu0 %v1553_v7 }
 0x490   :  { %1281 = vmatpush3.bf16.msra.mxu0 %v1366_v19 }
 0x491   :  { %1282 = vmatprep.subr.bf16.mxu0 %v1553_v7 }
 0x493   :  { %v1394_v20 = vpop.eup %1393 }
 0x494   :  { %v519_v21 = vsel %vm419_vm3, %v1394_v20, 0.0  ;;  %v1396_v33 = vpop.eup %1395 }
 0x495   :  { %520 = vadd.xlane.f32.xlu1 %v519_v21  ;;  %v513_v23 = vsel %vm419_vm3, %v1396_v33, 0.0 }
 0x497   :  { %v1398_v22 = vpop.eup %1397 }
 0x498   :  { %v516_v32 = vsel %vm419_vm3, %v1398_v22, 0.0  ;;  %v1400_v24 = vpop.eup %1399 }
 0x499   :  { %514 = vadd.xlane.f32.xlu1 %v513_v23  ;;  %517 = vadd.xlane.f32.xlu0 %v516_v32  ;;  %v510_v26 = vsel %vm419_vm3, %v1400_v24, 0.0  ;;  %v1367_v23 = vld [vmem:[#allocation5 + $0x8] sm:$0xff]  }
 0x49a   :  { %1283 = vmatpush3.bf16.msra.mxu0 %v1367_v23  ;;  %v1384_v23 = vld [vmem:[%s1944_s6 + $0x20] sm:$0xff]  }
 0x49b   :  { %1284 = vmatprep.subr.bf16.mxu0 %v1553_v7 }
 0x49d   :  { %511 = vadd.xlane.f32.xlu0 %v510_v26 }
 0x4d0   :  { %v680_v31 = vpop.xlane.xlu0 %679 }
 0x4d1   :  { %v690_v39 = vsub.f32 %v674_v58, %v680_v31 }
 0x4d3   :  { %v694_v37 = vmul.f32 1.442695, %v690_v39 }
 0x4d4   :  { %v683_v27 = vpop.xlane.xlu1 %682  ;;  %v686_v30 = vpop.xlane.xlu0 %685 }
 0x4d5   :  { %v692_v34 = vsub.f32 %v676_v63, %v686_v30  ;;  %v691_v35 = vsub.f32 %v675_v2, %v683_v27 }
 0x4d7   :  { %v698_v36 = vmul.f32 1.442695, %v692_v34  ;;  %v696_v41 = vmul.f32 1.442695, %v691_v35 }
 0x4d8   :  { %v689_v38 = vpop.xlane.xlu1 %688 }
 0x4d9   :  { %v693_v40 = vsub.f32 %v677_v5, %v689_v38  ;;  %1401 = vpow2.f32 %v698_v36 }
 0x4da   :  { %1403 = vpow2.f32 %v694_v37 }
 0x4db   :  { %v700_v42 = vmul.f32 1.442695, %v693_v40 }
 0x4dd   :  { %1405 = vpow2.f32 %v700_v42 }
 0x4de   :  { %1407 = vpow2.f32 %v696_v41 }
 0x4e6   :  { %v1402_v43 = vpop.eup %1401 }
 0x4e7   :  { %v708_v29 = vsel %vm419_vm3, %v1402_v43, 0.0  ;;  %v1404_v44 = vpop.eup %1403 }
 0x4e8   :  { %709 = vadd.xlane.f32.xlu0 %v708_v29  ;;  %v702_v48 = vsel %vm419_vm3, %v1404_v44, 0.0 }
 0x4ea   :  { %v1406_v45 = vpop.eup %1405 }
 0x4eb   :  { %v711_v46 = vsel %vm419_vm3, %v1406_v45, 0.0  ;;  %v1408_v47 = vpop.eup %1407 }
 0x4ec   :  { %712 = vadd.xlane.f32.xlu1 %v711_v46  ;;  %703 = vadd.xlane.f32.xlu0 %v702_v48  ;;  %v705_v49 = vsel %vm419_vm3, %v1408_v47, 0.0 }
 0x4f0   :  { %706 = vadd.xlane.f32.xlu1 %v705_v49 }
 0x501   :  { %724 = vrot.lane.b32.xlu1 %v532_v50, %s1562_s25 }
 0x502   :  { %534 = vrot.lane.b32.xlu0 %v532_v50, %s1564_s27 }
 0x51e   :  { %v521_v51 = vpop.xlane.xlu1 %520 }
 0x51f   :  { %1409 = vrcp.f32 %v521_v51 }
 0x522   :  { %v515_v52 = vpop.xlane.xlu1 %514  ;;  %v518_v53 = vpop.xlane.xlu0 %517 }
 0x523   :  { %1411 = vrcp.f32 %v518_v53 }
 0x524   :  { %1413 = vrcp.f32 %v515_v52 }
 0x526   :  { %v512_v54 = vpop.xlane.xlu0 %511 }
 0x527   :  { %1415 = vrcp.f32 %v512_v54 }
 0x52c   :  { %v1410_v55 = vpop.eup %1409 }
 0x52d   :  { %v529_v59 = vmul.f32 %v1410_v55, %v1394_v20 }
 0x530   :  { %v1412_v56 = vpop.eup %1411 }
 0x531   :  { %v1414_v57 = vpop.eup %1413  ;;  %v528_v58 = vmul.f32 %v1412_v56, %v1398_v22 }
 0x532   :  { %v527_v28 = vmul.f32 %v1414_v57, %v1396_v33 }
 0x533   :  { %v531_v61 = vpack.c.bf16 %v529_v59, %v528_v58 }
 0x534   :  { %v1416_v60 = vpop.eup %1415 }
 0x535   :  { %v526_v25 = vmul.f32 %v1416_v60, %v1400_v24  ;;  %v1368_v24 = vld [vmem:[#allocation5] sm:$0xff]  }
 0x536   :  { %1285 = vmatpush3.bf16.msra.mxu0 %v1368_v24  ;;  %v1386_v24 = vld [vmem:[%s1944_s6 + $0x10] sm:$0xff]  }
 0x537   :  { %v530_v62 = vpack.c.bf16 %v527_v28, %v526_v25  ;;  %1290 = vmatprep.subr.bf16.mxu0 %v1553_v7  ;;  %v1374_v28 = vld [vmem:[%s1943_s5 + $0x24] ss:$8 sps:$4 sm:$0xff]  }
 0x539   :  { %1262 = vmatprep.mubr.msk.bf16.mxu1 %vm419_vm3, %v530_v62  ;;  %v1372_v62 = vld [vmem:[%s1943_s5 + $0x20] ss:$8 sps:$4 sm:$0xff]  }
 0x571   :  { %v710_v63 = vpop.xlane.xlu0 %709 }
 0x575   :  { %v713_v2 = vpop.xlane.xlu1 %712  ;;  %v704_v3 = vpop.xlane.xlu0 %703 }
 0x576   :  { %1417 = vrcp.f32 %v713_v2  ;;  %v1375_v2 = vld [vmem:[%s1943_s5 + $0x10] ss:$8 sps:$4 sm:$0xff]  }
 0x577   :  { %1419 = vrcp.f32 %v704_v3  ;;  %v1378_v3 = vld [vmem:[%s1943_s5] ss:$8 sps:$4 sm:$0xff]  }
 0x578   :  { %1421 = vrcp.f32 %v710_v63  ;;  %v1377_v63 = vld [vmem:[%s1943_s5 + $0x14] ss:$8 sps:$4 sm:$0xff]  }
 0x579   :  { %v707_v4 = vpop.xlane.xlu1 %706  ;;  %v535_v5 = vpop.permute.xlu0 %534 }
 0x57a   :  { %1423 = vrcp.f32 %v707_v4  ;;  %1260 = vmatprep.subr.bf16.mxu1 %v535_v5  ;;  %v1380_v4 = vld [vmem:[%s1943_s5 + $0x4] ss:$8 sps:$4 sm:$0xff]  }
 0x57b   :  { %1261 = vmatpush3.bf16.msra.mxu1 %v535_v5  ;;  %v1567_v5 = vmov 0  }
 0x57d   :  { %v725_v6 = vpop.permute.xlu1 %724 }
 0x57e   :  { %1272 = vmatprep.subr.bf16.mxu1 %v725_v6  ;;  %1263 = vmatmul.mubr.msk.bf16.vlgmr.msra.gmra.mxu1 %vm419_vm3, %v531_v61 }
 0x57f   :  { %1273 = vmatpush3.bf16.msra.mxu1 %v725_v6 }
 0x583   :  { %v1418_v8 = vpop.eup %1417 }
 0x584   :  { %v1420_v9 = vpop.eup %1419  ;;  %v721_v12 = vmul.f32 %v1418_v8, %v1406_v45 }
 0x585   :  { %v1422_v10 = vpop.eup %1421  ;;  %v718_v13 = vmul.f32 %v1420_v9, %v1404_v44 }
 0x586   :  { %v720_v15 = vmul.f32 %v1422_v10, %v1402_v43 }
 0x587   :  { %v1424_v11 = vpop.eup %1423 }
 0x588   :  { %v719_v14 = vmul.f32 %v1424_v11, %v1408_v47  ;;  %v723_v17 = vpack.c.bf16 %v721_v12, %v720_v15 }
 0x58a   :  { %v722_v16 = vpack.c.bf16 %v719_v14, %v718_v13 }
 0x58c   :  { %1274 = vmatprep.mubr.msk.bf16.mxu1 %vm419_vm3, %v722_v16  ;;  %v1191_v16 = vld [vmem:[%s1940_s2] ss:$0 sm:$0xff] }
 0x58d   :  { %1275 = vmatmul.mubr.msk.bf16.vlgmr.msra.gmra.mxu1 %vm419_vm3, %v723_v17 }
 0x58e   :  { %1004 = vmatprep.mubr.bf16.mxu1 %v1567_v5 }
 0x63e   :  { %v1264_v20 = vpop.f32.mrf.mxu1 }
 0x640   :  { %v577_v21 = vpop.f32.mrf.mxu1 }
 0x642   :  { %v1265_v33 = vpop.f32.mrf.mxu1 }
 0x643   :  { %v1346_v22 = vpack.i.bf16 %v1265_v33, %v1264_v20  ;;  %v1382_v33 = vld [vmem:[%s1944_s6 + $0x30] sm:$0xff]  }
 0x644   :  { %v580_v32 = vpop.f32.mrf.mxu1 }
 0x645   :  { %1347 = vrot.lane.b32.xlu1 %v1346_v22, %s1562_s25  ;;  %v1383_v22 = vld [vmem:[%s1944_s6 + $0x28] sm:$0xff]  }
 0x64d   :  { %v1276_v26 = vpop.f32.mrf.mxu1 }
 0x64f   :  { %v767_v31 = vpop.f32.mrf.mxu1 }
 0x651   :  { %v1277_v39 = vpop.f32.mrf.mxu1 }
 0x652   :  { %v1356_v27 = vpack.i.bf16 %v1277_v39, %v1276_v26  ;;  %v1387_v26 = vld [vmem:[%s1944_s6 + $0x8] sm:$0xff]  }
 0x653   :  { %v770_v30 = vpop.f32.mrf.mxu1 }
 0x654   :  { %v1351_v34 = vpack.i.bf16 %v770_v30, %v767_v31  ;;  %1357 = vrot.lane.b32.xlu1 %v1356_v27, %s1561_s24  ;;  %v1388_v31 = vld [vmem:[%s1944_s6] sm:$0xff]  }
 0x656   :  { %1352 = vrot.lane.b32.xlu0 %v1351_v34, %s1564_s27 }
 0x6b7   :  { %v1348_v35 = vpop.permute.xlu1 %1347 }
 0x6b8   :  { %v1350_v36 = vunpack.i.h.bf16 %v1348_v35  ;;  %v1349_v37 = vunpack.i.l.bf16 %v1348_v35 }
 0x6ba   :  { %v806_v43 = vsel %vm419_vm3, %v577_v21, %v1349_v37  ;;  %v807_v29 = vsel %vm419_vm3, %v580_v32, %v1350_v36  ;;  %v1381_v21 = vld [vmem:[%s1944_s6 + $0x38] sm:$0xff]  }
 0x6bb   :  { %v1385_v32 = vld [vmem:[%s1944_s6 + $0x18] sm:$0xff]   ;;  %s1568_s6 = smov [#allocation10]  }
 0x6bc   :  { %s1158_s14 = sshll.u32 %s1568_s6, 4  ;;  %s1159_s14 = int_to_ptr.vmem [resolvable:$true] %s1158_s14 }
 0x6bd   :  { %s1517_s15 = scalar_lea.vmem %s1159_s14, 256  ;;  %p1522_p7 = scmp.lt.s32.totalorder %s1159_s14, %s1159_s14 }
 0x6be   :  { %p1518_p6 = scmp.ne.s32.totalorder %s1159_s14, %s1517_s15  ;;  %p1523_p8 = scmp.lt.s32.totalorder %s1517_s15, %s1517_s15 }
 0x6c0   :  { %p1524_p9 = por %p1523_p8, %p1522_p7 }
 0x6c2   :  { %p1525_p10 = pnand %p1524_p9, %p1518_p6 }
 0x6c6   :  { %v1358_v38 = vpop.permute.xlu1 %1357 }
 0x6c7   :  { %v1360_v44 = vunpack.i.h.bf16 %v1358_v38  ;;  %v1359_v45 = vunpack.i.l.bf16 %v1358_v38 }
 0x6c8   :  { %v1353_v40 = vpop.permute.xlu0 %1352 }
 0x6c9   :  { %v1355_v41 = vunpack.i.h.bf16 %v1353_v40  ;;  %v1354_v42 = vunpack.i.l.bf16 %v1353_v40 }
 0x6cb   :  { %v810_v46 = vsel %vm808_vm6, %v807_v29, %v1355_v41  ;;  %v809_v47 = vsel %vm808_vm6, %v806_v43, %v1354_v42 }
 0x6cc   :  { %v813_v48 = vsel %vm811_vm7, %v810_v46, %v1360_v44  ;;  %v812_v49 = vsel %vm811_vm7, %v809_v47, %v1359_v45 }
 0x6cd   :  { %v814_v50 = vpack.c.bf16 %v813_v48, %v812_v49 }
 0x6cf   :  { %1287 = vmatmul.mubr.msk.bf16.vlgmr.msra.gmra.mxu0 %vm93_vm0, %v814_v50 }
 0x6d0   :  { %1306 = vmatprep.mubr.msk.bf16.mxu0 %vm1554_vm1, %v1553_v7  ;;  %1291 = vmatpush3.bf16.msra.mxu0 %v1381_v21 }
 0x6d1   :  { %1292 = vmatprep.subr.bf16.mxu0 %v1553_v7 }
 0x6d4   :  { %1293 = vmatpush3.bf16.msra.mxu0 %v1382_v33 }
 0x6d5   :  { %1294 = vmatprep.subr.bf16.mxu0 %v1553_v7 }
 0x6d8   :  { %1295 = vmatpush3.bf16.msra.mxu0 %v1383_v22 }
 0x6d9   :  { %1296 = vmatprep.subr.bf16.mxu0 %v1553_v7 }
 0x6dc   :  { %1297 = vmatpush3.bf16.msra.mxu0 %v1384_v23 }
 0x6dd   :  { %1298 = vmatprep.subr.bf16.mxu0 %v1553_v7 }
 0x6e0   :  { %1299 = vmatpush3.bf16.msra.mxu0 %v1385_v32 }
 0x6e1   :  { %1300 = vmatprep.subr.bf16.mxu0 %v1553_v7 }
 0x6e4   :  { %1301 = vmatpush3.bf16.msra.mxu0 %v1386_v24 }
 0x6e5   :  { %1302 = vmatprep.subr.bf16.mxu0 %v1553_v7 }
 0x6e8   :  { %1303 = vmatpush3.bf16.msra.mxu0 %v1387_v26 }
 0x6e9   :  { %1304 = vmatprep.subr.bf16.mxu0 %v1553_v7 }
 0x6ec   :  { %1305 = vmatpush3.bf16.msra.mxu0 %v1388_v31 }
 0x78f   :  { %v884_v51 = vpop.f32.mrf.mxu0 }
 0x790   :  { %v891_v52 = vmul.f32 0.22, %v884_v51 }
 0x791   :  { %v1288_v53 = vpop.f32.mrf.mxu0 }
 0x792   :  { %v1852_v54 = vadd.f32 %v891_v52, %v1642_v0  ;;  %v1371_v0 = vld [vmem:[%s1943_s5 + $0x34] ss:$8 sps:$4 sm:$0xff]  }
 0x793   :  { %v887_v55 = vpop.f32.mrf.mxu0  ;;  %980 = vmatprep.subr.bf16.mxu1 %v1371_v0 }
 0x794   :  { %v892_v56 = vmul.f32 0.22, %v887_v55  ;;  %v895_v57 = vmul.f32 %v1852_v54, %v1852_v54 }
 0x795   :  { %v1289_v58 = vpop.f32.mrf.mxu0 }
 0x796   :  { %v1857_v59 = vadd.f32 %v892_v56, %v1644_v1  ;;  %v897_v60 = vsel %vm93_vm0, %v895_v57, 0.0  ;;  %v1369_v1 = vld [vmem:[%s1943_s5 + $0x30] ss:$8 sps:$4 sm:$0xff]  }
 0x797   :  { %898 = vadd.xlane.f32.xlu0 %v897_v60  ;;  %981 = vmatpush1.bf16.msra.mxu1 %v1369_v1 }
 0x798   :  { %v896_v61 = vmul.f32 %v1857_v59, %v1857_v59  ;;  %982 = vmatprep.subr.bf16.mxu1 %v1374_v28 }
 0x79a   :  { %v900_v25 = vsel %vm93_vm0, %v896_v61, 0.0 }
 0x79b   :  { %901 = vadd.xlane.f32.xlu1 %v900_v25  ;;  %983 = vmatpush1.bf16.msra.mxu1 %v1372_v62 }
 0x79c   :  { %984 = vmatprep.subr.bf16.mxu1 %v1377_v63 }
 0x79f   :  { %985 = vmatpush1.bf16.msra.mxu1 %v1375_v2 }
 0x7a0   :  { %986 = vmatprep.subr.bf16.mxu1 %v1380_v4 }
 0x7a3   :  { %987 = vmatpush1.bf16.msra.mxu1 %v1378_v3 }
 0x7ac   :  { %1145 = vrot.lane.b32.xlu1 %v1857_v59, %s1546_s12 }
 0x7ad   :  { %1143 = vrot.lane.b32.xlu0 %v1852_v54, %s1546_s12 }
 0x820   :  { %v899_v6 = vpop.xlane.xlu0 %898 }
 0x821   :  { %v903_v8 = vmul.f32 0.015625, %v899_v6 }
 0x823   :  { %v905_v9 = vadd.f32 1e-06, %v903_v8 }
 0x824   :  { %v902_v10 = vpop.xlane.xlu1 %901  ;;  %v1144_v51 = vpop.permute.xlu0 %1143 }
 0x825   :  { %1425 = vrsqrt.f32 %v905_v9  ;;  %v904_v11 = vmul.f32 0.015625, %v902_v10 }
 0x827   :  { %v906_v12 = vadd.f32 1e-06, %v904_v11 }
 0x828   :  { %v1146_v58 = vpop.permute.xlu1 %1145 }
 0x829   :  { %1427 = vrsqrt.f32 %v906_v12 }
 0x832   :  { %v1426_v13 = vpop.eup %1425 }
 0x833   :  { %v909_v14 = vmul.f32 %v1426_v13, %v1852_v54 }
 0x835   :  { %v918_v18 = vmul.f32 %v1191_v16, %v909_v14 }
 0x836   :  { %v1428_v15 = vpop.eup %1427 }
 0x837   :  { %v910_v17 = vmul.f32 %v1428_v15, %v1857_v59 }
 0x839   :  { %v919_v19 = vmul.f32 %v1191_v16, %v910_v17 }
 0x83b   :  { %v920_v20 = vpack.c.bf16 %v919_v19, %v918_v18 }
 0x83d   :  { %1200 = vmatmul.mubr.msk.bf16.vlgmr.msra.gmra.mxu1 %vm93_vm0, %v920_v20 }
 0x8fd   :  { %v1006_v39 = vpop.f32.mrf.mxu1 }
 0x8fe   :  { %v1201_v27 = vmul.f32 -1.442695, %v1006_v39 }
 0x8ff   :  { %v1008_v30 = vpop.f32.mrf.mxu1 }
 0x900   :  { %1429 = vpow2.f32 %v1201_v27 }
 0x901   :  { %v1010_v34 = vpop.f32.mrf.mxu1 }
 0x902   :  { %v1202_v35 = vmul.f32 -1.442695, %v1010_v34 }
 0x903   :  { %v1012_v29 = vpop.f32.mrf.mxu1 }
 0x904   :  { %1431 = vpow2.f32 %v1202_v35 }
 0x90d   :  { %v1430_v36 = vpop.eup %1429 }
 0x90e   :  { %v1021_v37 = vadd.f32 1.0, %v1430_v36 }
 0x910   :  { %1433 = vrcp.f32 %v1021_v37 }
 0x911   :  { %v1432_v38 = vpop.eup %1431 }
 0x912   :  { %v1022_v40 = vadd.f32 1.0, %v1432_v38 }
 0x914   :  { %1435 = vrcp.f32 %v1022_v40 }
 0x91d   :  { %v1434_v41 = vpop.eup %1433 }
 0x91e   :  { %v1027_v7 = vmul.f32 %v1434_v41, %v1006_v39 }
 0x920   :  { %v1029_v44 = vmul.f32 %v1027_v7, %v1008_v30 }
 0x921   :  { %v1436_v42 = vpop.eup %1435 }
 0x922   :  { %v1028_v43 = vmul.f32 %v1436_v42, %v1010_v34 }
 0x924   :  { %v1030_v45 = vmul.f32 %v1028_v43, %v1012_v29 }
 0x926   :  { %v1031_v46 = vpack.c.bf16 %v1030_v45, %v1029_v44 }
 0x928   :  { %1307 = vmatmul.mubr.bf16.vlgmr.msra.gmra.mxu0 %v1031_v46 }
 0x9e8   :  { %v1130_v47 = vpop.f32.mrf.mxu0 }
 0x9e9   :  { %v1137_v48 = vmul.f32 0.22, %v1130_v47 }
 0x9ea   :  { %v1308_v49 = vpop.f32.mrf.mxu0 }
 0x9eb   :  { %v1139_v50 = vadd.f32 %v1137_v48, %v1852_v54 }
 0x9ec   :  { %v1133_v52 = vpop.f32.mrf.mxu0 }
 0x9ed   :  { %v1138_v53 = vmul.f32 0.22, %v1133_v52  ;;  %v1149_v55 = vsel %vm93_vm0, %v1139_v50, %v1144_v51 }
 0x9ee   :  { %v1309_v56 = vpop.f32.mrf.mxu0  ;;  %1151 = vst [vmem:[#allocation10] sm:$0xff] %v1149_v55 }
 0x9ef   :  { %v1140_v57 = vadd.f32 %v1138_v53, %v1857_v59 }
 0x9f1   :  { %v1150_v60 = vsel %vm93_vm0, %v1140_v57, %v1146_v58 }
 0x9f2   :  { %1152 = vst [vmem:[#allocation10 + $0x8] sm:$0xff] %v1150_v60 }
 0x9f3   :  { %1528 = shalt.err (!%p1525_p10)
}
 0x9f4   :  { %1164 = dma.vmem_to_hbm [thread:$0]  %s1159_s14, 256, %s1947_s9, [#allocation4], %s1549_s19, %s1549_s19, %s1550_s20  }
 0x9f5   :  { %1543 = dma.done.wait [#allocation4], 256  }
 0x9f6   :  { %1544 = vsyncadd [#allocation4], 4294967040 }
 0x9f7   :  { %1168 = vsyncpa [#allocation3], 1 }
 0x9f8   :  { %1169 = vsyncpa [#allocation6], 1 }
 0x9f9   :  { %1170 = vsyncpa [#allocation9], 1 }
 0x9fa   :  { %1171 = vsyncpa [#allocation4], 1 }

</bundles_post_ra>
